<compile_context>
chip_gen: v6e
topology: v6e:2x2x1
jax: 0.10.0
libtpu: 0.0.40
codegen_flags: <defaults>
</compile_context>

<pallas_src>
import jax
import jax.numpy as jnp
from jax import lax
from jax.experimental import pallas as pl
from jax.experimental.pallas import tpu as pltpu


def _upsample_conv_kernel(x_ref, halo_ref, w_all_ref, w_halo_ref, b_ref, out_ref):
    x = x_ref[0]                      # (C, TL)   channels x length-tile
    halo = halo_ref[0, 0]             # (C, 2)    col 0 = x[:, t*TL-1], col 1 = x[:, (t+1)*TL]
    C, TL = x.shape

    # One fused MXU matmul. Row blocks of w_all:
    #   [0:C)   = W1+W2  (even-phase centre taps)
    #   [C:2C)  = W0+W1  (odd-phase centre taps)
    #   [2C:3C) = W0     (needs x[l-1] -> shift right by one lane)
    #   [3C:4C) = W2     (needs x[l+1] -> shift left by one lane)
    y = jnp.dot(w_all_ref[...], x, preferred_element_type=jnp.float32)      # (4C, TL)

    # Tiny halo matvec: rows [0:C) = W0 @ halo, rows [C:2C) = W2 @ halo.
    h = jnp.dot(w_halo_ref[...], halo, preferred_element_type=jnp.float32)  # (2C, 2)

    b = b_ref[...]                    # (C, 1), broadcasts over lanes

    # Shift the W0 / W2 streams by one lane, splicing the halo column at the edge.
    y_prev = jnp.concatenate([h[:C, 0:1], y[2 * C:3 * C, :TL - 1]], axis=1)  # W0 @ x[l-1]
    y_next = jnp.concatenate([y[3 * C:, 1:], h[C:, 1:2]], axis=1)            # W2 @ x[l+1]

    ye = y[:C] + y_prev + b           # out[2l]
    yo = y[C:2 * C] + y_next + b      # out[2l+1]

    # Single in-VMEM even/odd interleave on the final accumulators (cast first so
    # the lane shuffle runs on the output dtype).
    out = jnp.stack([ye.astype(out_ref.dtype), yo.astype(out_ref.dtype)], axis=-1)
    out_ref[0] = out.reshape(C, 2 * TL)


def _choose_tiles(L, target, N):
    """Pick (TL, Lp): length-tile and (possibly padded) total length.

    TL is either the full length (single tile) or a multiple of 128; Lp % TL == 0.
    """
    target = max(128, (target // 128) * 128)
    if L <= target:
        TL, Lp = L, L                                  # single full-length block
    elif L % target == 0:
        TL, Lp = target, L
    else:
        TL = None
        for cand in (1024, 512, 256, 128):             # 128-multiples dividing L
            if cand <= target and L % cand == 0:
                TL, Lp = cand, L
                break
        if TL is None:
            # Ragged L: pad up to a multiple of 128, pick the largest 128-multiple
            # tile <= target that divides the padded length.
            Lp = ((L + 127) // 128) * 128
            TL = target
            while Lp % TL != 0:
                TL -= 128
    # Occupancy (v7x has 2 TensorCores sharded over the "parallel" grid axes and
    # only 64 MiB VMEM): make sure the grid has a few steps before committing to
    # a huge tile.
    n_t = Lp // TL
    while N * n_t < 4 and TL % 256 == 0:
        TL //= 2
        n_t = Lp // TL
    return TL, Lp


def upsample_forward(x, weight, bias, with_conv=True, tile_l=512):
    """x: (N, C, L) f32; weight: (C, C, 3); bias: (C,).  Returns (N, C, 2L)."""
    N, C, L = x.shape

    if not with_conv:
        # Pure nearest-2x upsample (module built with with_conv=False): trivial,
        # done in plain JAX rather than a Pallas kernel.
        return jnp.repeat(x, 2, axis=-1)

    TL, Lp = _choose_tiles(L, tile_l, N)
    n_t = Lp // TL
    xp = x if Lp == L else jnp.pad(x, ((0, 0), (0, 0), (0, Lp - L)))

    # Fold the 3-tap kernel into one fused LHS (cheap host-side JAX glue).
    w0, w1, w2 = weight[:, :, 0], weight[:, :, 1], weight[:, :, 2]
    w_all = jnp.concatenate([w1 + w2, w0 + w1, w0, w2], axis=0)   # (4C, C)
    w_halo = jnp.concatenate([w0, w2], axis=0)                     # (2C, C)
    b2d = bias.reshape(C, 1)

    # Per-tile halo columns via strided slices + one zero column (no full-x pad).
    zcol = jnp.zeros((N, C, 1), x.dtype)
    left = jnp.concatenate([zcol, xp[:, :, TL - 1:Lp - 1:TL]], axis=2)   # (N, C, n_t)
    right = jnp.concatenate([xp[:, :, TL:Lp:TL], zcol], axis=2)          # (N, C, n_t)
    halo = jnp.transpose(jnp.stack([left, right], axis=-1), (0, 2, 1, 3))  # (N, n_t, C, 2)

    full = lambda b, t: (0, 0)
    out = pl.pallas_call(
        _upsample_conv_kernel,
        out_shape=jax.ShapeDtypeStruct((N, C, 2 * Lp), x.dtype),
        grid_spec=pltpu.PrefetchScalarGridSpec(
            num_scalar_prefetch=0,
            grid=(N, n_t),
            in_specs=[
                pl.BlockSpec((1, C, TL), lambda b, t: (b, 0, t)),        # x tile
                pl.BlockSpec((1, 1, C, 2), lambda b, t: (b, t, 0, 0)),   # merged halos
                pl.BlockSpec((4 * C, C), full),                          # fused taps
                pl.BlockSpec((2 * C, C), full),                          # [W0; W2] for halo
                pl.BlockSpec((C, 1), full),                              # bias
            ],
            out_specs=pl.BlockSpec((1, C, 2 * TL), lambda b, t: (b, 0, t)),
        ),
        compiler_params=pltpu.CompilerParams(
            dimension_semantics=("parallel", "parallel"),
            vmem_limit_bytes=48 * 1024 * 1024),
    )(xp, halo, w_all, w_halo, b2d)

    if Lp != L:
        out = out[:, :, :2 * L]
    return out


def _reference_forward(x, weight, bias, with_conv=True):
    """Pure-JAX reference matching the PyTorch module exactly."""
    x_up = jnp.repeat(x, 2, axis=-1)
    if not with_conv:
        return x_up
    y = lax.conv_general_dilated(
        x_up, weight, window_strides=(1,), padding=((1, 1),),
        dimension_numbers=("NCH", "OIH", "NCH"))
    return y + bias[None, :, None]


if __name__ == "__main__":
    key = jax.random.PRNGKey(0)

    def _check(N, C, L, sub_key, tile_l=512):
        k_x, k_w, k_b = jax.random.split(sub_key, 3)
        x = jax.random.normal(k_x, (N, C, L), dtype=jnp.float32)
        bound = 1.0 / (C * 3) ** 0.5
        weight = jax.random.uniform(k_w, (C, C, 3), minval=-bound, maxval=bound,
                                    dtype=jnp.float32)
        bias = jax.random.uniform(k_b, (C,), minval=-bound, maxval=bound,
                                  dtype=jnp.float32)
        out = jax.block_until_ready(
            upsample_forward(x, weight, bias, True, tile_l=tile_l))
        ref = _reference_forward(x, weight, bias, True)
        assert out.shape == (N, C, 2 * L), out.shape
        err = float(jnp.max(jnp.abs(out - ref)))
        assert jnp.allclose(out, ref, atol=5e-4, rtol=5e-4), err

    keys = jax.random.split(key, 4)
    _check(2, 4, 16, keys[0])               # module toy shape, single full-L tile
    _check(1, 8, 256, keys[1])              # multi-tile halo path (128-tiles)
    _check(1, 8, 600, keys[2], tile_l=256)  # ragged L -> padded to 640, 128-tiles
    _check(1, 128, 512, keys[3])            # MXU-sized C, occupancy-shrunk tiles
    print("KERNEL_OK")
</pallas_src>

<mosaic_0001>
module attributes {stable_mosaic.version = 11 : i64} {
  func.func @_upsample_conv_kernel(%arg0: i32, %arg1: i32, %arg2: memref<1x4x16xf32, #tpu.memory_space<vmem>>, %arg3: memref<1x1x4x2xf32, #tpu.memory_space<vmem>>, %arg4: memref<16x4xf32, #tpu.memory_space<vmem>>, %arg5: memref<8x4xf32, #tpu.memory_space<vmem>>, %arg6: memref<4x1xf32, #tpu.memory_space<vmem>>, %arg7: memref<1x4x32xf32, #tpu.memory_space<vmem>>) attributes {dimension_semantics = [#tpu.dimension_semantics<parallel>, #tpu.dimension_semantics<parallel>], iteration_bounds = array<i64: 2, 1>, scalar_prefetch = 0 : i64, scratch_operands = 0 : i64, tpu.core_type = #tpu.core_type<tc>, window_params = [{transform_indices = @transform_0, window_bounds = array<i64: 1, 4, 16>}, {transform_indices = @transform_1, window_bounds = array<i64: 1, 1, 4, 2>}, {pipeline_mode = #tpu.pipeline_mode<synchronous>, transform_indices = @transform_2, window_bounds = array<i64: 16, 4>}, {pipeline_mode = #tpu.pipeline_mode<synchronous>, transform_indices = @transform_3, window_bounds = array<i64: 8, 4>}, {pipeline_mode = #tpu.pipeline_mode<synchronous>, transform_indices = @transform_4, window_bounds = array<i64: 4, 1>}, {transform_indices = @transform_5, window_bounds = array<i64: 1, 4, 32>}]} {
    %c0 = arith.constant 0 : index
    %c0_0 = arith.constant 0 : index
    %c0_1 = arith.constant 0 : index
    %0 = vector.load %arg2[%c0, %c0_0, %c0_1] : memref<1x4x16xf32, #tpu.memory_space<vmem>>, vector<1x4x16xf32>
    %1 = vector.shape_cast %0 : vector<1x4x16xf32> to vector<4x16xf32>
    %c0_2 = arith.constant 0 : index
    %c0_3 = arith.constant 0 : index
    %c0_4 = arith.constant 0 : index
    %c0_5 = arith.constant 0 : index
    %2 = vector.load %arg3[%c0_2, %c0_3, %c0_4, %c0_5] : memref<1x1x4x2xf32, #tpu.memory_space<vmem>>, vector<1x1x4x2xf32>
    %3 = vector.shape_cast %2 : vector<1x1x4x2xf32> to vector<4x2xf32>
    %c0_6 = arith.constant 0 : index
    %c0_7 = arith.constant 0 : index
    %4 = vector.load %arg4[%c0_6, %c0_7] : memref<16x4xf32, #tpu.memory_space<vmem>>, vector<16x4xf32>
    %cst = arith.constant dense<0.000000e+00> : vector<16x16xf32>
    %5 = tpu.matmul %4, %1, %cst {dimension_numbers = #tpu.dot_dimension_numbers<[1], [0], [0], [1], [0, 0, 1, 1], [], []>} : vector<16x4xf32>, vector<4x16xf32>, vector<16x16xf32> -> vector<16x16xf32>
    %c0_8 = arith.constant 0 : index
    %c0_9 = arith.constant 0 : index
    %6 = vector.load %arg5[%c0_8, %c0_9] : memref<8x4xf32, #tpu.memory_space<vmem>>, vector<8x4xf32>
    %cst_10 = arith.constant dense<0.000000e+00> : vector<8x2xf32>
    %7 = tpu.matmul %6, %3, %cst_10 {dimension_numbers = #tpu.dot_dimension_numbers<[1], [0], [0], [1], [0, 0, 1, 1], [], []>} : vector<8x4xf32>, vector<4x2xf32>, vector<8x2xf32> -> vector<8x2xf32>
    %c0_11 = arith.constant 0 : index
    %c0_12 = arith.constant 0 : index
    %8 = vector.load %arg6[%c0_11, %c0_12] : memref<4x1xf32, #tpu.memory_space<vmem>>, vector<4x1xf32>
    %9 = vector.extract_strided_slice %7 {offsets = [0, 0], sizes = [4, 1], strides = [1, 1]} : vector<8x2xf32> to vector<4x1xf32>
    %10 = vector.extract_strided_slice %5 {offsets = [8, 0], sizes = [4, 15], strides = [1, 1]} : vector<16x16xf32> to vector<4x15xf32>
    %11 = tpu.concatenate %9, %10 in 1 : vector<4x1xf32>, vector<4x15xf32> -> vector<4x16xf32>
    %12 = vector.extract_strided_slice %5 {offsets = [12, 1], sizes = [4, 15], strides = [1, 1]} : vector<16x16xf32> to vector<4x15xf32>
    %13 = vector.extract_strided_slice %7 {offsets = [4, 1], sizes = [4, 1], strides = [1, 1]} : vector<8x2xf32> to vector<4x1xf32>
    %14 = tpu.concatenate %12, %13 in 1 : vector<4x15xf32>, vector<4x1xf32> -> vector<4x16xf32>
    %15 = vector.extract_strided_slice %5 {offsets = [0, 0], sizes = [4, 16], strides = [1, 1]} : vector<16x16xf32> to vector<4x16xf32>
    %16 = arith.addf %15, %11 : vector<4x16xf32>
    %17 = vector.broadcast %8 : vector<4x1xf32> to vector<4x16xf32>
    %18 = arith.addf %16, %17 : vector<4x16xf32>
    %19 = vector.extract_strided_slice %5 {offsets = [4, 0], sizes = [4, 16], strides = [1, 1]} : vector<16x16xf32> to vector<4x16xf32>
    %20 = arith.addf %19, %14 : vector<4x16xf32>
    %21 = vector.broadcast %8 : vector<4x1xf32> to vector<4x16xf32>
    %22 = arith.addf %20, %21 : vector<4x16xf32>
    %23 = vector.shape_cast %18 : vector<4x16xf32> to vector<4x16x1xf32>
    %24 = vector.shape_cast %22 : vector<4x16xf32> to vector<4x16x1xf32>
    %25 = tpu.concatenate %23, %24 in 2 : vector<4x16x1xf32>, vector<4x16x1xf32> -> vector<4x16x2xf32>
    %26 = vector.shape_cast %25 : vector<4x16x2xf32> to vector<4x32xf32>
    %c0_13 = arith.constant 0 : index
    %c0_14 = arith.constant 0 : index
    %c0_15 = arith.constant 0 : index
    %27 = vector.load %arg7[%c0_13, %c0_14, %c0_15] : memref<1x4x32xf32, #tpu.memory_space<vmem>>, vector<1x4x32xf32>
    %28 = vector.shape_cast %27 : vector<1x4x32xf32> to vector<4x32xf32>
    %29 = vector.shape_cast %26 : vector<4x32xf32> to vector<1x4x32xf32>
    tpu.vector_store %arg7[%c0_13, %c0_14, %c0_15], %29 {strides = array<i32>} : memref<1x4x32xf32, #tpu.memory_space<vmem>>, vector<1x4x32xf32>,
    return
  }
  func.func @transform_0(%arg0: i32, %arg1: i32) -> (i32, i32, i32) {
    %c0_i32 = arith.constant 0 : i32
    %c0_i32_0 = arith.constant 0 : i32
    return %arg0, %c0_i32, %arg1 : i32, i32, i32
  }
  func.func @transform_1(%arg0: i32, %arg1: i32) -> (i32, i32, i32, i32) {
    %c0_i32 = arith.constant 0 : i32
    %c0_i32_0 = arith.constant 0 : i32
    %c0_i32_1 = arith.constant 0 : i32
    return %arg0, %arg1, %c0_i32, %c0_i32_0 : i32, i32, i32, i32
  }
  func.func @transform_2(%arg0: i32, %arg1: i32) -> (i32, i32) {
    %c0_i32 = arith.constant 0 : i32
    %c0_i32_0 = arith.constant 0 : i32
    %c0_i32_1 = arith.constant 0 : i32
    return %c0_i32, %c0_i32_0 : i32, i32
  }
  func.func @transform_3(%arg0: i32, %arg1: i32) -> (i32, i32) {
    %c0_i32 = arith.constant 0 : i32
    %c0_i32_0 = arith.constant 0 : i32
    %c0_i32_1 = arith.constant 0 : i32
    return %c0_i32, %c0_i32_0 : i32, i32
  }
  func.func @transform_4(%arg0: i32, %arg1: i32) -> (i32, i32) {
    %c0_i32 = arith.constant 0 : i32
    %c0_i32_0 = arith.constant 0 : i32
    %c0_i32_1 = arith.constant 0 : i32
    return %c0_i32, %c0_i32_0 : i32, i32
  }
  func.func @transform_5(%arg0: i32, %arg1: i32) -> (i32, i32, i32) {
    %c0_i32 = arith.constant 0 : i32
    %c0_i32_0 = arith.constant 0 : i32
    return %arg0, %c0_i32, %arg1 : i32, i32, i32
  }
}

</mosaic_0001>

<bundles_post_ra>
// kernel: tpu_custom_call.1
= control target key start
LH: loop header
LB: loop body
LE: loop exit
PB: predicated region body
PF: predicated region fallthrough
CT: control target
= control target key end

     0   :  { %10 = vsyncpa [#allocation3], 0  ;;  %s1303_s0 = inlined_call_operand.vmem [shape: f32[2,4,16], index: 0, kind: input, shape index: {}]   ;;  %s1304_s1 = inlined_call_operand.vmem [shape: f32[2,1,4,2], index: 1, kind: input, shape index: {}]   ;;  %s1305_s2 = inlined_call_operand.vmem [shape: f32[16,4], index: 2, kind: input, shape index: {}]   ;;  %s1306_s3 = inlined_call_operand.vmem [shape: f32[8,4], index: 3, kind: input, shape index: {}]   ;;  %s1307_s4 = inlined_call_operand.vmem [shape: f32[4,1], index: 4, kind: input, shape index: {}]   ;;  %s1308_s5 = inlined_call_operand.hbm [shape: f32[2,4,32], index: 5, kind: output, shape index: {}]  }
   0x1   :  { %12 = vsyncpa [#allocation3 + $0x1], 0  ;;  %s1132_s18 = smov 0   ;;  %s1134_s19 = smov 0  }
   0x2   :  { %s1136_s20 = smov 0   ;;  %s1138_s21 = smov 0  }
   0x3   :  { %s1140_s22 = smov 0   ;;  %s1142_s23 = smov 0  }
   0x4 LB: > { %s891_s24 = sadd.s32 4294967295, %s1077_s23   ;;  %s892_s25 = sadd.s32 4294967294, %s1077_s23   ;;  %s1077_s23 = sphi %s1142_s23, %s18_s23   ;;  %s1073_s22 = sphi %s1140_s22, %s1315_s22   ;;  %s1069_s21 = sphi %s1138_s21, %s1314_s21   ;;  %s1065_s20 = sphi %s1136_s20, %s1313_s20   ;;  %s1061_s19 = sphi %s1134_s19, %s1312_s19   ;;  %s1057_s18 = sphi %s1132_s18, %s1311_s18  }
   0x5   : > { %s30_s26 = sadd.s32 1, %s1073_s22  ;;  %s158_s27 = sadd.s32 1, %s1065_s20 }
   0x6   : > { %p32_p0 = scmp.ge.s32.totalorder %s30_s26, 2  ;;  %p168_p1 = scmp.ne.s32.totalorder %s1065_s20, %s1061_s19 }
   0x7   : > { %p169_p2 = scmp.eq.s32.totalorder %s891_s24, 1  ;;  %p174_p3 = scmp.ne.s32.totalorder %s1061_s19, %s1057_s18 }
   0x8   : > { %s1317_s26 = smov (%p32_p0, %s30_s26), 0  ;;  %p175_p5 = scmp.eq.s32.totalorder %s892_s25, 1 }
   0x9   : > { %p1172_p4 = por %p169_p2, %p168_p1  ;;  %s153_s29 = ssub.s32 %s1073_s22, %s1317_s26 }
   0xa   : > { %p895_p6 = scmp.ge.s32.totalorder %s1077_s23, 1  ;;  %p156_p7 = scmp.eq.s32.totalorder %s153_s29, 0 }
   0xb   : > { %p1179_p8 = por %p175_p5, %p174_p3  ;;  %p222_p9 = scmp.lt.s32.totalorder %s1077_s23, 3 }
   0xc   : > { %s1185_s6 = scalar_select %p156_p7, %s1065_s20, %s158_s27  }
   0xd   : > { %p223_p10 = pnand %p895_p6, %p222_p9 }
   0xe   : > { %p259_p11 = scmp.lt.s32.totalorder (!%p223_p10), %s1069_s21, 1  ;;  %s1082_s8 = smov (!%p223_p10), 127  }
   0xf   : > { %226 = sbr.rel (%p223_p10) target bundleno = 637 (0x27d), region = 40  ;;  %s1083_s9 = smov (!%p223_p10), 1  }
  0x10   : > { %s1084_s10 = smov (!%p223_p10), 14   ;;  %s1089_s13 = smov (!%p223_p10), 8  }
  0x11   : > { %s1090_s14 = smov (!%p223_p10), 6   ;;  %s1092_s16 = smov (!%p223_p10), 10  }
  0x12   : > { %s1093_s17 = smov (!%p223_p10), 16   ;;  %s1095_s25 = smov (!%p223_p10), 20  }
  0x13   : > { %s1096_s27 = smov (!%p223_p10), 22   ;;  %s1097_s29 = smov (!%p223_p10), 24  }
  0x14   : > { %v275_v0 = vld [vmem:[%s1305_s2] sm:$0xff]  ;;  %vm277_vm0 = vcmask 31744   ;;  %v1079_v1 = vmov 0.0   ;;  %s260_s11 = scalar_select %p259_p11, %s1069_s21, 1  ;;  %vm1080_vm1 = vmmov 0   ;;  %v1081_v3 = vmov 0  }
  0x15   : > { %915 = vmatprep.mubr.msk.f32.mxu0 %vm277_vm0, %v275_v0  ;;  %918 = vmatprep.subr.mxu1 %v1079_v1  ;;  %v440_v2 = vld [vmem:[%s1307_s4] sm:$0xf]  ;;  %vm284_vm2 = vcmask 1043456   ;;  %v276_v6 = vld [vmem:[%s1305_s2 + $0x8] sm:$0xff]  ;;  %v467_v12 = vlaneseq  ;;  %vm445_vm3 = vcmask 7168   ;;  %vm454_vm4 = vcmask 121856  }
  0x16   : > { %920 = vmatprep.mubr.msk.f32.mxu1 %vm1080_vm1, %v1079_v1  ;;  %1000 = vset.pattern.permute.xlu0 %v1081_v3  ;;  %s897_s12 = sshll.u32 %s260_s11, 2  ;;  %v363_v4 = vld [vmem:[%s1306_s3] sm:$0xff]  ;;  %v1085_v45 = vmov 1983009808   ;;  %v1086_v47 = vmov 1934713408  }
  0x17   : > { %459 = vperm.xlu0 %1000, %v440_v2   ;;  %s265_s15 = scalar_lea.vmem %s1303_s0, %s897_s12  ;;  %s272_s24 = scalar_lea.vmem %s1304_s1, %s897_s12  ;;  %v1213_v13 = vshrl.u32 %v467_v12, 7  ;;  %v566_v46 = vunpack.c.l.s4 %v1085_v45  ;;  %v598_v48 = vunpack.c.l.s4 %v1086_v47  ;;  %vm759_vm5 = vcmask 15360  }
  0x18   : > { %v273_v5 = vld [vmem:[%s265_s15] sm:$0xf]  ;;  %s1087_s11 = smov 4   ;;  %s1088_s12 = smov 2   ;;  %vm762_vm6 = vcmask 48128   ;;  %vm764_vm7 = vcmask 64512  }
  0x19   : > { %v274_v7 = vld [vmem:[%s272_s24] sm:$0xf]  ;;  %913 = vmatprep.subr.msk.mxu0 %vm284_vm2, %v273_v5  ;;  %v480_v19 = vsub.s32 1, %v1213_v13  ;;  %v469_v20 = vsub.s32 0, %v1213_v13  ;;  %v502_v24 = vsub.s32 3, %v1213_v13  ;;  %v491_v28 = vsub.s32 2, %v1213_v13 }
  0x1a   : > { %919 = vmatpush3.msk.msra.mxu1 %vm284_vm2, %v274_v7  ;;  %914 = vmatpush3.msk.msra.mxu0 %vm284_vm2, %v273_v5  ;;  %v524_v30 = vsub.s32 5, %v1213_v13  ;;  %v513_v34 = vsub.s32 4, %v1213_v13  ;;  %v546_v37 = vsub.s32 7, %v1213_v13  ;;  %v535_v38 = vsub.s32 6, %v1213_v13  ;;  %s1091_s15 = smov 12   ;;  %s1094_s24 = smov 18  }
  0x1b   : > { %921 = vmatmul.mubr.msk.f32.vlgmr.msra.gmra.mxu1 %vm277_vm0, %v363_v4  ;;  %916 = vmatmul.mubr.msk.f32.vlgmr.msra.gmra.mxu0 %vm277_vm0, %v276_v6  ;;  %v567_v51 = vunpack.c.0.s8 %v566_v46  ;;  %v599_v52 = vunpack.c.0.s8 %v598_v48  ;;  %s1098_s7 = smov 26   ;;  %vm766_vm8 = vcmask 80896   ;;  %vm768_vm9 = vcmask 97280  }
  0x1c   : > { %vm770_vm10 = vcmask 113664   ;;  %vm772_vm11 = vcmask 130048   ;;  %vm774_vm12 = vcmask 146432   ;;  %vm776_vm13 = vcmask 162816  }
  0x1d   : > { %v570_v53 = vsub.s32 %v567_v51, %v1213_v13  ;;  %v1230_v0 = vsub.s32 %v599_v52, %v1213_v13  ;;  %vm778_vm14 = vcmask 179200   ;;  %vm780_vm15 = vcmask 195584  }
  0x1e   : > { %vm784_vm1 = vcmask 228352   ;;  %vm786_vm2 = vcmask 244736  }
  0x92   : > { %v460_v11 = vpop.permute.xlu0 %459 }
  0x93   : > { %v464_v29 = vrot.slane %v460_v11, 4 }
  0xdb   : > { %v436_v8 = vpop.f32.mrf.mxu1  ;;  %v917_v9 = vpop.f32.mrf.mxu0 }
  0xdc   : > { %447 = vrot.lane.b32.xlu1 %v917_v9, %s1082_s8  ;;  %442 = vrot.lane.b32.xlu0 %v917_v9, %s1083_s9  ;;  %s1099_s8 = smov 28   ;;  %s1100_s9 = smov 30  }
  0xdd   : > { %v922_v10 = vpop.f32.mrf.mxu1  ;;  %v354_v16 = vpop.f32.mrf.mxu0 }
  0xe0   : > { %451 = vrot.lane.b32.xlu1 %v436_v8, %s1084_s10 }
 0x14e   : > { %v448_v14 = vpop.permute.xlu1 %447  ;;  %v443_v15 = vpop.permute.xlu0 %442 }
 0x14f   : > { %v446_v17 = vsel %vm445_vm3, %v436_v8, %v443_v15 }
 0x150   : > { %v456_v18 = vadd.f32 %v446_v17, %v354_v16 }
 0x152   : > { %v462_v21 = vadd.f32 %v460_v11, %v456_v18  ;;  %v452_v22 = vpop.permute.xlu1 %451 }
 0x153   : > { %v455_v23 = vsel %vm454_vm4, %v448_v14, %v452_v22 }
 0x154   : > { %v463_v25 = vadd.f32 %v455_v23, %v354_v16  ;;  %v481_v26 = vrot.slane %v462_v21, %v480_v19  ;;  %v470_v27 = vrot.slane %v462_v21, %v469_v20  ;;  %v503_v32 = vrot.slane %v462_v21, %v502_v24 }
 0x155   : > { %v492_v33 = vrot.slane %v462_v21, %v491_v28 }
 0x156   : > { %483 = vbcast.lane.b32.xlu1 %v481_v26, 256  ;;  %472 = vbcast.lane.b32.xlu0 %v470_v27, 256  ;;  %v466_v31 = vadd.f32 %v464_v29, %v463_v25 }
 0x158   : > { %v525_v35 = vrot.slane %v466_v31, %v524_v30  ;;  %v514_v36 = vrot.slane %v466_v31, %v513_v34  ;;  %v547_v39 = vrot.slane %v466_v31, %v546_v37  ;;  %v536_v40 = vrot.slane %v466_v31, %v535_v38 }
 0x15a   : > { %505 = vbcast.lane.b32.xlu1 %v503_v32, 256  ;;  %494 = vbcast.lane.b32.xlu0 %v492_v33, 256 }
 0x15e   : > { %527 = vbcast.lane.b32.xlu1 %v525_v35, 256  ;;  %516 = vbcast.lane.b32.xlu0 %v514_v36, 256 }
 0x162   : > { %549 = vbcast.lane.b32.xlu1 %v547_v39, 256  ;;  %538 = vbcast.lane.b32.xlu0 %v536_v40, 256 }
 0x166   : > { %487 = vbcast.lane.b32.xlu1 %v481_v26, 264  ;;  %476 = vbcast.lane.b32.xlu0 %v470_v27, 264 }
 0x16a   : > { %509 = vbcast.lane.b32.xlu1 %v503_v32, 264  ;;  %498 = vbcast.lane.b32.xlu0 %v492_v33, 264 }
 0x16e   : > { %531 = vbcast.lane.b32.xlu1 %v525_v35, 264  ;;  %520 = vbcast.lane.b32.xlu0 %v514_v36, 264 }
 0x172   : > { %553 = vbcast.lane.b32.xlu1 %v547_v39, 264  ;;  %542 = vbcast.lane.b32.xlu0 %v536_v40, 264 }
 0x1c8   : > { %v484_v41 = vpop.permute.xlu1 %483  ;;  %v473_v42 = vpop.permute.xlu0 %472 }
 0x1cc   : > { %v506_v43 = vpop.permute.xlu1 %505  ;;  %v495_v44 = vpop.permute.xlu0 %494 }
 0x1d0   : > { %v528_v49 = vpop.permute.xlu1 %527  ;;  %v517_v50 = vpop.permute.xlu0 %516 }
 0x1d1   : > { %v557_v56 = vsel %vm445_vm3, %v484_v41, %v528_v49  ;;  %v555_v57 = vsel %vm445_vm3, %v473_v42, %v517_v50 }
 0x1d4   : > { %v550_v54 = vpop.permute.xlu1 %549  ;;  %v539_v55 = vpop.permute.xlu0 %538 }
 0x1d5   : > { %v561_v58 = vsel %vm445_vm3, %v506_v43, %v550_v54  ;;  %v559_v59 = vsel %vm445_vm3, %v495_v44, %v539_v55 }
 0x1d6   : > { %v579_v60 = vcombine.low %v557_v56, %v561_v58  ;;  %v580_v61 = vcombine.high %v557_v56, %v561_v58  ;;  %v563_v62 = vcombine.low %v555_v57, %v559_v59  ;;  %v564_v63 = vcombine.high %v555_v57, %v559_v59 }
 0x1d8   : > { %v587_v2 = vrot.slane %v579_v60, %v570_v53  ;;  %v594_v3 = vrot.slane %v580_v61, %v570_v53  ;;  %v571_v4 = vrot.slane %v563_v62, %v570_v53  ;;  %v578_v5 = vrot.slane %v564_v63, %v570_v53  ;;  %v488_v6 = vpop.permute.xlu1 %487  ;;  %v477_v7 = vpop.permute.xlu0 %476 }
 0x1da   : > { %v595_v8 = vcombine.low %v571_v4, %v587_v2  ;;  %v596_v9 = vcombine.high %v571_v4, %v587_v2  ;;  %v611_v15 = vcombine.low %v578_v5, %v594_v3  ;;  %v612_v19 = vcombine.high %v578_v5, %v594_v3 }
 0x1dc   : > { %v510_v10 = vpop.permute.xlu1 %509  ;;  %v499_v11 = vpop.permute.xlu0 %498  ;;  %v610_v12 = vrot.slane %v596_v9, %v1230_v0  ;;  %v1234_v14 = vrot.slane %v595_v8, %v1230_v0  ;;  %v619_v18 = vrot.slane %v611_v15, %v1230_v0  ;;  %v626_v23 = vrot.slane %v612_v19, %v1230_v0 }
 0x1de   : > { %704 = vrot.lane.b32.xlu1 %v610_v12, %s1087_s11  ;;  %v627_v13 = vcombine.high %v1234_v14, %v1079_v1  ;;  %v628_v20 = vcombine.high %v610_v12, %v1079_v1  ;;  %v629_v24 = vcombine.high %v619_v18, %v1079_v1  ;;  %v630_v35 = vcombine.high %v626_v23, %v1079_v1 }
 0x1e0   : > { %v532_v16 = vpop.permute.xlu1 %531  ;;  %700 = vrot.lane.b32.xlu0 %v627_v13, %s1088_s12  ;;  %v521_v17 = vpop.permute.xlu0 %520  ;;  %s905_s12 = sshll.u32 %s1069_s21, 6  ;;  %s1101_s21 = smov [#allocation2]  }
 0x1e1   : > { %v558_v25 = vsel %vm445_vm3, %v488_v6, %v532_v16  ;;  %v556_v26 = vsel %vm445_vm3, %v477_v7, %v521_v17 }
 0x1e2   : > { %712 = vrot.lane.b32.xlu1 %v619_v18, %s1089_s13 }
 0x1e4   : > { %v554_v21 = vpop.permute.xlu1 %553  ;;  %708 = vrot.lane.b32.xlu0 %v628_v20, %s1090_s14  ;;  %v543_v22 = vpop.permute.xlu0 %542 }
 0x1e5   : > { %v562_v27 = vsel %vm445_vm3, %v510_v10, %v554_v21  ;;  %v560_v28 = vsel %vm445_vm3, %v499_v11, %v543_v22  ;;  %vm788_vm3 = vcmask 257024  }
 0x1e6   : > { %v647_v29 = vcombine.low %v558_v25, %v562_v27  ;;  %v648_v30 = vcombine.high %v558_v25, %v562_v27  ;;  %v631_v31 = vcombine.low %v556_v26, %v560_v28  ;;  %v632_v32 = vcombine.high %v556_v26, %v560_v28  ;;  %720 = vrot.lane.b32.xlu1 %v626_v23, %s1091_s15 }
 0x1e8   : > { %v655_v33 = vrot.slane %v647_v29, %v570_v53  ;;  %v639_v34 = vrot.slane %v631_v31, %v570_v53  ;;  %716 = vrot.lane.b32.xlu0 %v629_v24, %s1092_s16  ;;  %v662_v36 = vrot.slane %v648_v30, %v570_v53  ;;  %v646_v37 = vrot.slane %v632_v32, %v570_v53 }
 0x1ea   : > { %v663_v38 = vcombine.low %v639_v34, %v655_v33  ;;  %v664_v39 = vcombine.high %v639_v34, %v655_v33  ;;  %v679_v43 = vcombine.low %v646_v37, %v662_v36  ;;  %v680_v46 = vcombine.high %v646_v37, %v662_v36 }
 0x1ec   : > { %724 = vrot.lane.b32.xlu0 %v630_v35, %s1084_s10  ;;  %v671_v40 = vrot.slane %v663_v38, %v1230_v0  ;;  %v678_v42 = vrot.slane %v664_v39, %v1230_v0  ;;  %v687_v45 = vrot.slane %v679_v43, %v1230_v0  ;;  %v694_v48 = vrot.slane %v680_v46, %v1230_v0  ;;  %s256_s10 = sand.u32 1, %s1061_s19  }
 0x1ed   : > { %s896_s11 = sshll.u32 %s256_s10, 2 }
 0x1ee   : > { %728 = vrot.lane.b32.xlu1 %v671_v40, %s1093_s17  ;;  %v695_v41 = vcombine.high %v671_v40, %v1079_v1  ;;  %v696_v44 = vcombine.high %v678_v42, %v1079_v1  ;;  %v697_v47 = vcombine.high %v687_v45, %v1079_v1  ;;  %v698_v49 = vcombine.high %v694_v48, %v1079_v1  ;;  %s258_s13 = scalar_lea.vmem [#allocation2], %s896_s11  ;;  %s1263_s17 = scalar_lea.hbm %s1308_s5, %s905_s12 }
 0x1ef   : > { %s805_s14 = sshll.u32 %s258_s13, 4  ;;  %s806_s14 = int_to_ptr.vmem [resolvable:$true] %s805_s14 }
 0x1f0   : > { %732 = vrot.lane.b32.xlu0 %v695_v41, %s1094_s24  ;;  %s791_s24 = scalar_lea.sflag [#allocation3], %s256_s10 }
 0x1f2   : > { %736 = vrot.lane.b32.xlu1 %v678_v42, %s1095_s25  ;;  %s1001_s25 = scalar_lea.vmem %s806_s14, 64 }
 0x1f3   : > { %p1002_p12 = scmp.ne.s32.totalorder %s806_s14, %s1001_s25 }
 0x1f4   : > { %740 = vrot.lane.b32.xlu0 %v696_v44, %s1096_s27  ;;  %s1005_s27 = sshll.u32 %s1101_s21, 4  ;;  %s1006_s27 = int_to_ptr.vmem [resolvable:$false] %s1005_s27 }
 0x1f5   : > { %p1003_p13 = pnand %p1002_p12, %p1172_p4  ;;  %p1008_p1 = scmp.lt.s32.totalorder %s806_s14, %s1006_s27 }
 0x1f6   : > { %744 = vrot.lane.b32.xlu1 %v687_v45, %s1097_s29  ;;  %s1007_s29 = scalar_lea.vmem %s1006_s27, 128 }
 0x1f7   : > { %p1004_p0 = pneg %p1003_p13  ;;  %p1009_p2 = scmp.lt.s32.totalorder %s1007_s29, %s1001_s25 }
 0x1f8   : > { %748 = vrot.lane.b32.xlu0 %v697_v47, %s1098_s7 }
 0x1f9   : > { %p1010_p3 = por %p1009_p2, %p1008_p1 }
 0x1fa   : > { %752 = vrot.lane.b32.xlu1 %v694_v48, %s1099_s8 }
 0x1fb   : > { %p1011_p5 = pnand %p1010_p3, %p1004_p0 }
 0x1fc   : > { %756 = vrot.lane.b32.xlu0 %v698_v49, %s1100_s9 }
 0x250   : > { %v705_v50 = vpop.permute.xlu1 %704 }
 0x252   : > { %v701_v51 = vpop.permute.xlu0 %700 }
 0x253   : > { %v760_v52 = vsel %vm759_vm5, %v1234_v14, %v701_v51 }
 0x254   : > { %v713_v53 = vpop.permute.xlu1 %712  ;;  %v761_v54 = vsel %vm277_vm0, %v760_v52, %v705_v50  ;;  %vm782_vm0 = vcmask 211968  }
 0x256   : > { %v709_v55 = vpop.permute.xlu0 %708 }
 0x257   : > { %v763_v56 = vsel %vm762_vm6, %v761_v54, %v709_v55 }
 0x258   : > { %v765_v57 = vsel %vm764_vm7, %v763_v56, %v713_v53  ;;  %v721_v1 = vpop.permute.xlu1 %720 }
 0x25a   : > { %v717_v58 = vpop.permute.xlu0 %716 }
 0x25b   : > { %v767_v59 = vsel %vm766_vm8, %v765_v57, %v717_v58 }
 0x25c   : > { %v769_v60 = vsel %vm768_vm9, %v767_v59, %v721_v1 }
 0x25e   : > { %v725_v61 = vpop.permute.xlu0 %724 }
 0x25f   : > { %v771_v62 = vsel %vm770_vm10, %v769_v60, %v725_v61 }
 0x260   : > { %v729_v63 = vpop.permute.xlu1 %728 }
 0x261   : > { %v773_v0 = vsel %vm772_vm11, %v771_v62, %v729_v63 }
 0x262   : > { %v733_v2 = vpop.permute.xlu0 %732 }
 0x263   : > { %v775_v3 = vsel %vm774_vm12, %v773_v0, %v733_v2 }
 0x264   : > { %v737_v4 = vpop.permute.xlu1 %736 }
 0x265   : > { %v777_v5 = vsel %vm776_vm13, %v775_v3, %v737_v4 }
 0x266   : > { %v741_v6 = vpop.permute.xlu0 %740 }
 0x267   : > { %v779_v7 = vsel %vm778_vm14, %v777_v5, %v741_v6 }
 0x268   : > { %v745_v8 = vpop.permute.xlu1 %744 }
 0x269   : > { %v781_v9 = vsel %vm780_vm15, %v779_v7, %v745_v8 }
 0x26a   : > { %v749_v10 = vpop.permute.xlu0 %748 }
 0x26b   : > { %v783_v11 = vsel %vm782_vm0, %v781_v9, %v749_v10 }
 0x26c   : > { %v753_v12 = vpop.permute.xlu1 %752 }
 0x26d   : > { %v785_v14 = vsel %vm784_vm1, %v783_v11, %v753_v12 }
 0x26e   : > { %v757_v15 = vpop.permute.xlu0 %756 }
 0x26f   : > { %v787_v13 = vsel %vm786_vm2, %v785_v14, %v757_v15 }
 0x270   : > { %789 = vst.msk [vmem:[%s258_s13] sm:$0xf] %vm788_vm3, %v787_v13 }
 0x271   : > { %1014 = shalt.err (!%p1011_p5)
}
 0x272   : > { %s1015_s7 = scalar_lea.hbm %s1263_s17, 64  ;;  %s1019_s10 = scalar_lea.hbm %s1308_s5, 128 }
 0x273   : > { %p1016_p6 = scmp.ne.s32.totalorder %s1263_s17, %s1015_s7  ;;  %p1020_p10 = scmp.lt.s32.totalorder %s1263_s17, %s1308_s5 }
 0x274   : > { %p1021_p11 = scmp.lt.s32.totalorder %s1019_s10, %s1015_s7 }
 0x275   : > { %p1017_p7 = pnand %p1016_p6, %p1172_p4 }
 0x276   : > { %p1022_p12 = por %p1021_p11, %p1020_p10 }
 0x277   : > { %p1018_p9 = pneg %p1017_p7 }
 0x279   : > { %p1023_p13 = pnand %p1022_p12, %p1018_p9 }
 0x27b   : > { %1026 = shalt.err (!%p1023_p13)
}
 0x27c   : > { %923 = dma.vmem_to_hbm [thread:$0]  (%p1172_p4), %s806_s14, 64, %s1263_s17, %s791_s24  }
 0x27d PF: > { %p929_p0 = scmp.ge.s32.totalorder %s1077_s23, 2  ;;  %s817_s13 = sand.u32 1, %s1057_s18  }
 0x27e   : > { %s818_s15 = scalar_lea.sflag [#allocation3], %s817_s13 }
 0x27f   : > { %p926_p1 = pnand %p929_p0, %p1179_p8 }
 0x281   : > { %p927_p2 = pneg %p926_p1 }
 0x283   : > { %1052 = dma.done.wait (%p927_p2), %s818_s15, 64  }
 0x284   : > { %1054 = vsyncadd (%p927_p2), %s818_s15, 4294967232  ;;  %s18_s23 = sadd.s32 1, %s1077_s23   ;;  %s1311_s18 = smov %s1061_s19 }
 0x285   : > { %p15_p3 = scmp.ge.s32.totalorder %s18_s23, 4   ;;  %s1312_s19 = smov %s1065_s20 }
 0x286   : > { %s1313_s20 = smov %s1185_s6  ;;  %s1314_s21 = smov %s1073_s22 }
 0x287   : > { %s1315_s22 = smov %s1317_s26  ;;  %17 = sbr.rel (!%p15_p3) target bundleno = 4 (0x4), region = 78 }
 0x28c   :  { %823 = vsyncpa [#allocation3], 1 }
 0x28d   :  { %825 = vsyncpa [#allocation3 + $0x1], 1 }

</bundles_post_ra>
